<compile_context>
chip_gen: v7x
topology: tpu7x:2x2x1
jax: 0.10.0
libtpu: 0.0.40
codegen_flags: <defaults>
</compile_context>

<pallas_src>
import math
import numpy as np
import jax
import jax.numpy as jnp
from jax.experimental import pallas as pl
from jax.experimental.pallas import tpu as pltpu

_LANE = 128
_VMEM_BUDGET = 44 << 20        # working-set target (conservative for v7x: 64 MiB VMEM)
_VMEM_LIMIT_FLOOR = 16 << 20   # never request less scoped VMEM than the v5e default
_VMEM_LIMIT_CAP = 56 << 20     # never request more than fits v7x physical VMEM


def _round_up(x, m):
    return ((x + m - 1) // m) * m


# ------------------------------ fused kernel --------------------------------

def _fused_mlp_kernel(x_ref, *refs):
    """refs = (w0, b0, w1, b1, ..., wL, bL, out_ref).  Hidden layers use ReLU.

    Eval-mode BatchNorm is already folded into the (bf16) weights / (f32)
    biases and dropout is identity in eval mode, so the whole MLP is a chain
    of (matmul + bias [+ relu]).  Matmul operands are bf16 (MXU-native on
    v5e/v6e/v7x); accumulation and elementwise math stay in f32.
    """
    o_ref = refs[-1]
    wb = refs[:-1]
    n_linear = len(wb) // 2
    h = x_ref[...]                                     # f32 activations
    for i in range(n_linear):
        w = wb[2 * i][...]                             # bf16 (in_p, out_p)
        b = wb[2 * i + 1][...]                         # f32  (1, out_p)
        h = jnp.dot(h.astype(jnp.bfloat16), w,
                    preferred_element_type=jnp.float32) + b
        if i < n_linear - 1:
            h = jnp.maximum(h, 0.0)                    # ReLU on hidden layers only
    o_ref[...] = h


# ------------------------------ MLP wrapper ----------------------------------

class MLPPallas:
    """Inference-mode MLP with eval BatchNorm folded into the linears."""

    def __init__(self, mlp_input_dim, mlp_dim, num_classes, num_mlp_layers,
                 mlp_bn, classifier_dropout_rate=0.0, seed=0, batch_tile=512):
        self.mlp_input_dim = mlp_input_dim
        self.mlp_dim = mlp_dim
        self.num_classes = num_classes
        self.num_mlp_layers = num_mlp_layers
        self.mlp_bn = mlp_bn
        self.classifier_dropout_rate = classifier_dropout_rate  # identity in eval
        self.batch_tile = batch_tile

        rng = np.random.RandomState(seed)

        def he_kaiming(out_f, in_f):
            # HeKaimingInitializer: normal(scale=sqrt(4/(fan_out+fan_in))), shape (out,in)
            return rng.normal(scale=math.sqrt(4.0 / (out_f + in_f)),
                              size=(out_f, in_f)).astype(np.float32)

        def bn_affine(dim, eps=1e-5):
            # Eval-mode BatchNorm1d with fresh params: gamma=1, beta=0, mean=0, var=1.
            gamma = np.ones(dim, np.float32)
            beta = np.zeros(dim, np.float32)
            mean = np.zeros(dim, np.float32)
            var = np.ones(dim, np.float32)
            scale = (gamma / np.sqrt(var + eps)).astype(np.float32)
            shift = (beta - mean * scale).astype(np.float32)
            return scale, shift

        # Original (unfolded / unpadded) parameters, kept for the reference path.
        self._ref = {}
        pending = None                      # BN affine waiting to be folded into next linear
        if mlp_bn:
            pending = bn_affine(mlp_input_dim)
            self._ref["bn_inp"] = pending

        self.in_padded = _round_up(mlp_input_dim, _LANE)   # lane-dense K for layer 0

        fused_np = []                       # folded + lane-padded (Wt, b) per linear (f32)
        out_dims = [mlp_dim] * num_mlp_layers + [num_classes]
        feat = mlp_input_dim                # logical in-dim of the current linear
        cur_in = self.in_padded             # padded activation width entering it
        for i, out_dim in enumerate(out_dims):
            W = he_kaiming(out_dim, feat)   # PyTorch layout (out, in)
            b = np.zeros(out_dim, np.float32)  # ZeroInitializer
            self._ref[f"l{i}"] = (W, b)

            Wt = np.ascontiguousarray(W.T)  # (in, out) so the kernel does x @ Wt
            if pending is not None:         # (x*scale + shift) @ Wt + b  ==  x @ Wt' + b'
                scale, shift = pending
                b = b + shift @ Wt
                Wt = scale[:, None] * Wt

            is_last = i == len(out_dims) - 1
            if mlp_bn and not is_last:
                pending = bn_affine(out_dim)
                self._ref[f"bn{i}"] = pending
            else:
                pending = None

            out_p = _round_up(out_dim, _LANE)              # lane-dense output columns
            Wt_p = np.zeros((cur_in, out_p), np.float32)   # zero rows/cols in padding
            Wt_p[:feat, :out_dim] = Wt
            b_p = np.zeros((1, out_p), np.float32)
            b_p[0, :out_dim] = b
            fused_np.append((Wt_p, b_p))

            feat = out_dim
            cur_in = out_p

        self._fused_np = fused_np           # f32 copies (exactness / reference checks)
        # Device copies: bf16 weights (MXU operands), f32 biases.
        self.fused = [(jnp.asarray(w, jnp.bfloat16), jnp.asarray(b, jnp.float32))
                      for w, b in fused_np]
        self.out_padded = cur_in

    # ---------------------------- sizing helpers -----------------------------

    def _widths(self):
        return [self.in_padded] + [w.shape[1] for w, _ in self._fused_np]

    def _weight_bytes(self):
        return sum(w.size * 2 + b.size * 4 for w, b in self._fused_np)  # bf16 W + f32 b

    def _vmem_bytes(self, tb):
        widths = self._widths()
        act = 2 * tb * widths[0] * 4        # double-buffered input tile (f32)
        act += 2 * tb * widths[-1] * 4      # double-buffered output tile (f32)
        act += 3 * tb * max(widths) * 4     # live intermediates (f32 h, bf16 copy, slack)
        return self._weight_bytes() + act

    def _pick_batch_tile(self):
        tb = max(_LANE, _round_up(self.batch_tile, _LANE))
        while tb > _LANE and self._vmem_bytes(tb) > _VMEM_BUDGET:
            tb = max(_LANE, _round_up(tb // 2, _LANE))
        return tb

    def _cost_estimate(self, B):
        widths = self._widths()
        flops = 2 * B * sum(widths[i] * widths[i + 1] for i in range(len(widths) - 1))
        bytes_accessed = (B * widths[0] * 4 + B * widths[-1] * 4 + self._weight_bytes())
        return pl.CostEstimate(flops=int(flops), transcendentals=0,
                               bytes_accessed=int(bytes_accessed))

    def _pad_cols_jnp(self, x):
        B, D = x.shape
        if D == self.in_padded:
            return x
        return jnp.pad(x, ((0, 0), (0, self.in_padded - D)))

    def _pad_cols_np(self, x):
        B, D = x.shape
        if D == self.in_padded:
            return x
        out = np.zeros((B, self.in_padded), x.dtype)
        out[:, :D] = x
        return out

    # ------------------------------- forward ---------------------------------

    def _grid_call(self, xp, flat, TB, resident_weights, ce, vmem_limit):
        B, Dp = xp.shape
        out_p = self.out_padded
        in_specs = [pl.BlockSpec((TB, Dp), lambda i: (i, 0))]
        if resident_weights:
            # Unblocked, fully resident in VMEM: single copy, not double-buffered.
            for _ in flat:
                in_specs.append(pl.BlockSpec(memory_space=pltpu.MemorySpace.VMEM))
        else:
            # Fallback: constant-index blocked specs (known-good, but double-buffered).
            for p in flat:
                in_specs.append(pl.BlockSpec(p.shape, lambda i: (0, 0)))
        return pl.pallas_call(
            _fused_mlp_kernel,
            out_shape=jax.ShapeDtypeStruct((B, out_p), jnp.float32),
            grid=(pl.cdiv(B, TB),),
            in_specs=in_specs,
            out_specs=pl.BlockSpec((TB, out_p), lambda i: (i, 0)),
            compiler_params=pltpu.CompilerParams(
                dimension_semantics=("parallel",),
                vmem_limit_bytes=vmem_limit),
            cost_estimate=ce,
        )(xp, *flat)

    def __call__(self, x):
        # TODO(synk): training-mode dropout (random mask + 1/(1-p) scaling) and
        # BatchNorm batch-statistics updates are not emitted (eval mode only).
        x = jnp.asarray(x, jnp.float32)
        B, D = x.shape
        assert D == self.mlp_input_dim
        xp = self._pad_cols_jnp(x)          # lane-dense K for the first matmul
        out_p = self.out_padded
        flat = [p for wb in self.fused for p in wb]
        n_in = 1 + len(flat)

        TB = self._pick_batch_tile()
        est = self._vmem_bytes(min(max(B, 8), TB))
        vmem_limit = int(min(max(est + est // 4, _VMEM_LIMIT_FLOOR), _VMEM_LIMIT_CAP))
        ce = self._cost_estimate(B)

        if B <= TB:
            # Small batch: single invocation, whole arrays resident in VMEM.
            y_pad = pl.pallas_call(
                _fused_mlp_kernel,
                out_shape=jax.ShapeDtypeStruct((B, out_p), jnp.float32),
                in_specs=[pl.BlockSpec(memory_space=pltpu.MemorySpace.VMEM)] * n_in,
                out_specs=pl.BlockSpec(memory_space=pltpu.MemorySpace.VMEM),
                compiler_params=pltpu.CompilerParams(vmem_limit_bytes=vmem_limit),
                cost_estimate=ce,
            )(xp, *flat)
        else:
            # Large batch: tile only the batch dim (cdiv grid, no batch padding);
            # weights stay resident in VMEM.  B > TB guarantees >= 2 grid steps,
            # so the 'parallel' axis can shard across v7x's two TensorCores.
            try:
                y_pad = self._grid_call(xp, flat, TB, True, ce, vmem_limit)
            except Exception:
                y_pad = self._grid_call(xp, flat, TB, False, ce, vmem_limit)
        return y_pad[:, :self.num_classes]

    # ----------------------------- references --------------------------------

    def reference_folded_jnp(self, x):
        """Pure-JAX forward on the SAME folded/padded bf16 params (kernel-mechanics check)."""
        h = self._pad_cols_jnp(jnp.asarray(x, jnp.float32))
        n = len(self.fused)
        for i, (w, b) in enumerate(self.fused):
            h = jnp.dot(h.astype(jnp.bfloat16), w,
                        preferred_element_type=jnp.float32) + b
            if i < n - 1:
                h = jnp.maximum(h, 0.0)
        return h[:, :self.num_classes]

    def _np_forward_folded(self, x):
        """float64 numpy forward with the folded/padded f32 params (fold exactness check)."""
        h = self._pad_cols_np(np.asarray(x, np.float64))
        n = len(self._fused_np)
        for i, (w, b) in enumerate(self._fused_np):
            h = h @ w.astype(np.float64) + b.astype(np.float64)
            if i < n - 1:
                h = np.maximum(h, 0.0)
        return h[:, :self.num_classes]

    def reference(self, x):
        """Original module semantics (eval mode), float64 numpy ground truth."""
        h = np.asarray(x, np.float64)
        if self.mlp_bn:
            scale, shift = self._ref["bn_inp"]
            h = h * scale + shift
        # dropout: identity in eval mode / rate 0.0
        for i in range(self.num_mlp_layers):
            W, b = self._ref[f"l{i}"]
            h = np.maximum(h @ W.T.astype(np.float64) + b, 0.0)
            if self.mlp_bn:
                scale, shift = self._ref[f"bn{i}"]
                h = h * scale + shift
        W, b = self._ref[f"l{self.num_mlp_layers}"]
        return h @ W.T.astype(np.float64) + b


# --------------------------------- main ---------------------------------------

if __name__ == "__main__":
    batch = 8
    mlp_input_dim = 32
    mlp_dim = 64
    num_classes = 8
    num_mlp_layers = 2

    model = MLPPallas(mlp_input_dim, mlp_dim, num_classes, num_mlp_layers,
                      mlp_bn=True, classifier_dropout_rate=0.0, seed=0)

    key = jax.random.PRNGKey(0)
    x_small = jax.random.normal(key, (batch, mlp_input_dim), dtype=jnp.float32)
    x_small_np = np.asarray(x_small)

    # 0) BN-fold + lane padding exactly reproduces original semantics (f64, f32 params).
    np.testing.assert_allclose(model._np_forward_folded(x_small_np),
                               model.reference(x_small_np),
                               rtol=1e-5, atol=1e-6)

    # 1) Small batch: single fused kernel, no grid.  Kernel vs identical-math JAX
    #    reference (same bf16 casts) must match tightly; vs f64 reference loosely
    #    (bf16 matmul operands).
    y = model(x_small)
    jax.block_until_ready(y)
    np.testing.assert_allclose(np.asarray(y),
                               np.asarray(model.reference_folded_jnp(x_small)),
                               rtol=1e-2, atol=1e-2)
    np.testing.assert_allclose(np.asarray(y), model.reference(x_small_np),
                               rtol=1e-1, atol=1e-1)

    # 2) Batch-tiled 'parallel' grid path with a partial last block (300 = 2*128 + 44),
    #    resident VMEM weights, no wrapper-side batch padding.
    model_grid = MLPPallas(mlp_input_dim, mlp_dim, num_classes, num_mlp_layers,
                           mlp_bn=True, classifier_dropout_rate=0.0, seed=0,
                           batch_tile=128)
    x_big = jax.random.normal(jax.random.PRNGKey(1), (300, mlp_input_dim),
                              dtype=jnp.float32)
    y_big = model_grid(x_big)
    jax.block_until_ready(y_big)
    np.testing.assert_allclose(np.asarray(y_big),
                               np.asarray(model_grid.reference_folded_jnp(x_big)),
                               rtol=1e-2, atol=1e-2)
    np.testing.assert_allclose(np.asarray(y_big),
                               model_grid.reference(np.asarray(x_big)),
                               rtol=1e-1, atol=1e-1)

    print("KERNEL_OK")
</pallas_src>

<mosaic_0001>
module attributes {stable_mosaic.version = 11 : i64} {
  func.func @_fused_mlp_kernel(%arg0: memref<8x128xf32, #tpu.memory_space<vmem>>, %arg1: memref<128x128xbf16, #tpu.memory_space<vmem>>, %arg2: memref<1x128xf32, #tpu.memory_space<vmem>>, %arg3: memref<128x128xbf16, #tpu.memory_space<vmem>>, %arg4: memref<1x128xf32, #tpu.memory_space<vmem>>, %arg5: memref<128x128xbf16, #tpu.memory_space<vmem>>, %arg6: memref<1x128xf32, #tpu.memory_space<vmem>>, %arg7: memref<8x128xf32, #tpu.memory_space<vmem>>) attributes {dimension_semantics = [], scalar_prefetch = 0 : i64, scratch_operands = 0 : i64, tpu.core_type = #tpu.core_type<tc>} {
    %c0 = arith.constant 0 : index
    %c0_0 = arith.constant 0 : index
    %0 = vector.load %arg0[%c0, %c0_0] : memref<8x128xf32, #tpu.memory_space<vmem>>, vector<8x128xf32>
    %c0_1 = arith.constant 0 : index
    %c0_2 = arith.constant 0 : index
    %1 = vector.load %arg1[%c0_1, %c0_2] : memref<128x128xbf16, #tpu.memory_space<vmem>>, vector<128x128xbf16>
    %c0_3 = arith.constant 0 : index
    %c0_4 = arith.constant 0 : index
    %2 = vector.load %arg2[%c0_3, %c0_4] : memref<1x128xf32, #tpu.memory_space<vmem>>, vector<1x128xf32>
    %3 = arith.truncf %0 : vector<8x128xf32> to vector<8x128xbf16>
    %cst = arith.constant dense<0.000000e+00> : vector<8x128xf32>
    %4 = tpu.matmul %3, %1, %cst {dimension_numbers = #tpu.dot_dimension_numbers<[1], [0], [0], [1], [0, 0, 1, 1], [], []>} : vector<8x128xbf16>, vector<128x128xbf16>, vector<8x128xf32> -> vector<8x128xf32>
    %5 = vector.broadcast %2 : vector<1x128xf32> to vector<8x128xf32>
    %6 = arith.addf %4, %5 : vector<8x128xf32>
    %cst_5 = arith.constant 0.000000e+00 : f32
    %7 = vector.broadcast %cst_5 : f32 to vector<8x128xf32>
    %8 = arith.maximumf %6, %7 : vector<8x128xf32>
    %c0_6 = arith.constant 0 : index
    %c0_7 = arith.constant 0 : index
    %9 = vector.load %arg3[%c0_6, %c0_7] : memref<128x128xbf16, #tpu.memory_space<vmem>>, vector<128x128xbf16>
    %c0_8 = arith.constant 0 : index
    %c0_9 = arith.constant 0 : index
    %10 = vector.load %arg4[%c0_8, %c0_9] : memref<1x128xf32, #tpu.memory_space<vmem>>, vector<1x128xf32>
    %11 = arith.truncf %8 : vector<8x128xf32> to vector<8x128xbf16>
    %cst_10 = arith.constant dense<0.000000e+00> : vector<8x128xf32>
    %12 = tpu.matmul %11, %9, %cst_10 {dimension_numbers = #tpu.dot_dimension_numbers<[1], [0], [0], [1], [0, 0, 1, 1], [], []>} : vector<8x128xbf16>, vector<128x128xbf16>, vector<8x128xf32> -> vector<8x128xf32>
    %13 = vector.broadcast %10 : vector<1x128xf32> to vector<8x128xf32>
    %14 = arith.addf %12, %13 : vector<8x128xf32>
    %cst_11 = arith.constant 0.000000e+00 : f32
    %15 = vector.broadcast %cst_11 : f32 to vector<8x128xf32>
    %16 = arith.maximumf %14, %15 : vector<8x128xf32>
    %c0_12 = arith.constant 0 : index
    %c0_13 = arith.constant 0 : index
    %17 = vector.load %arg5[%c0_12, %c0_13] : memref<128x128xbf16, #tpu.memory_space<vmem>>, vector<128x128xbf16>
    %c0_14 = arith.constant 0 : index
    %c0_15 = arith.constant 0 : index
    %18 = vector.load %arg6[%c0_14, %c0_15] : memref<1x128xf32, #tpu.memory_space<vmem>>, vector<1x128xf32>
    %19 = arith.truncf %16 : vector<8x128xf32> to vector<8x128xbf16>
    %cst_16 = arith.constant dense<0.000000e+00> : vector<8x128xf32>
    %20 = tpu.matmul %19, %17, %cst_16 {dimension_numbers = #tpu.dot_dimension_numbers<[1], [0], [0], [1], [0, 0, 1, 1], [], []>} : vector<8x128xbf16>, vector<128x128xbf16>, vector<8x128xf32> -> vector<8x128xf32>
    %21 = vector.broadcast %18 : vector<1x128xf32> to vector<8x128xf32>
    %22 = arith.addf %20, %21 : vector<8x128xf32>
    %c0_17 = arith.constant 0 : index
    %c0_18 = arith.constant 0 : index
    %23 = vector.load %arg7[%c0_17, %c0_18] : memref<8x128xf32, #tpu.memory_space<vmem>>, vector<8x128xf32>
    tpu.vector_store %arg7[%c0_17, %c0_18], %22 {strides = array<i32>} : memref<8x128xf32, #tpu.memory_space<vmem>>, vector<8x128xf32>,
    return
  }
}

</mosaic_0001>

<bundles_post_ra>
// kernel: tpu_custom_call.1
= control target key start
LH: loop header
LB: loop body
LE: loop exit
PB: predicated region body
PF: predicated region fallthrough
CT: control target
= control target key end

     0   :  { %12 = vsyncpa [#allocation3], 0  ;;  %s860_s0 = inlined_call_operand.hbm [shape: f32[8,128], index: 0, kind: input, shape index: {}]   ;;  %s861_s1 = inlined_call_operand.hbm [shape: bf16[128,128], index: 1, kind: input, shape index: {}]   ;;  %s862_s2 = inlined_call_operand.vmem [shape: f32[1,128], index: 2, kind: input, shape index: {}]   ;;  %s863_s3 = inlined_call_operand.hbm [shape: bf16[128,128], index: 3, kind: input, shape index: {}]   ;;  %s864_s4 = inlined_call_operand.vmem [shape: f32[1,128], index: 4, kind: input, shape index: {}]   ;;  %s865_s5 = inlined_call_operand.hbm [shape: bf16[128,128], index: 5, kind: input, shape index: {}]   ;;  %s866_s6 = inlined_call_operand.vmem [shape: f32[1,128], index: 6, kind: input, shape index: {}]   ;;  %s867_s7 = inlined_call_operand.hbm [shape: f32[8,128], index: 7, kind: output, shape index: {}]  }
   0x1   :  { %13 = vsyncpa [#allocation6], 0 }
   0x2   :  { %14 = vsyncpa [#allocation9], 0 }
   0x3   :  { %15 = vsyncpa [#allocation4], 0  ;;  %s703_s24 = smov [#allocation5]   ;;  %s585_s28 = scalar_lea.hbm %s861_s1, 1024 }
   0x4   :  { %s31_s25 = sshll.u32 %s703_s24, 4  ;;  %p586_p0 = scmp.ne.s32.totalorder %s861_s1, %s585_s28  ;;  %s32_s25 = int_to_ptr.vmem [resolvable:$true] %s31_s25 }
   0x5   :  { %p589_p1 = scmp.lt.u32.totalorder %s585_s28, %s861_s1 }
   0x7   :  { %p591_p2 = pnand %p589_p1, %p586_p0 }
   0x9   :  { %594 = shalt.err (!%p591_p2)
}
   0xa   :  { %s595_s10 = scalar_lea.vmem %s32_s25, 1024  ;;  %p600_p4 = scmp.lt.s32.totalorder %s32_s25, %s32_s25 }
   0xb   :  { %p596_p3 = scmp.ne.s32.totalorder %s32_s25, %s595_s10  ;;  %p601_p5 = scmp.lt.s32.totalorder %s595_s10, %s595_s10 }
   0xd   :  { %p602_p6 = por %p601_p5, %p600_p4 }
   0xf   :  { %p603_p7 = pnand %p602_p6, %p596_p3 }
  0x11   :  { %606 = shalt.err (!%p603_p7)
}
  0x12   :  { %s704_s11 = smov 64   ;;  %s705_s12 = smov 4  }
  0x13   :  { %37 = dma.hbm_to_vmem [thread:$0]  %s861_s1, 1024, %s32_s25, [#allocation6], %s704_s11, %s704_s11, %s705_s12  }
  0x14   :  { %s706_s15 = smov [#allocation2]   ;;  %s707_s17 = smov [#allocation7]  }
  0x15   :  { %s22_s16 = sshll.u32 %s706_s15, 4  ;;  %s45_s18 = sshll.u32 %s707_s17, 4  ;;  %s23_s16 = int_to_ptr.vmem [resolvable:$true] %s22_s16  ;;  %s46_s18 = int_to_ptr.vmem [resolvable:$true] %s45_s18 }
  0x16   :  { %s607_s21 = scalar_lea.hbm %s860_s0, 128 }
  0x17   :  { %p608_p8 = scmp.ne.s32.totalorder %s860_s0, %s607_s21  ;;  %p611_p9 = scmp.lt.u32.totalorder %s607_s21, %s860_s0 }
  0x19   :  { %p613_p10 = pnand %p611_p9, %p608_p8 }
  0x1b   :  { %616 = shalt.err (!%p613_p10)
}
  0x1c   :  { %s617_s1 = scalar_lea.vmem %s23_s16, 128  ;;  %p622_p12 = scmp.lt.s32.totalorder %s23_s16, %s23_s16 }
  0x1d   :  { %p618_p11 = scmp.ne.s32.totalorder %s23_s16, %s617_s1  ;;  %p623_p13 = scmp.lt.s32.totalorder %s617_s1, %s617_s1 }
  0x1f   :  { %p624_p0 = por %p623_p13, %p622_p12 }
  0x21   :  { %p625_p1 = pnand %p624_p0, %p618_p11 }
  0x23   :  { %628 = shalt.err (!%p625_p1)
}
  0x24   :  { %25 = dma.hbm_to_vmem [thread:$0]  %s860_s0, 128, %s23_s16, [#allocation3]  }
  0x25   :  { %s629_s30 = scalar_lea.hbm %s863_s3, 1024 }
  0x26   :  { %p630_p2 = scmp.ne.s32.totalorder %s863_s3, %s629_s30  ;;  %p633_p3 = scmp.lt.u32.totalorder %s629_s30, %s863_s3 }
  0x28   :  { %p635_p4 = pnand %p633_p3, %p630_p2 }
  0x2a   :  { %638 = shalt.err (!%p635_p4)
}
  0x2b   :  { %s639_s14 = scalar_lea.vmem %s46_s18, 1024  ;;  %p644_p6 = scmp.lt.s32.totalorder %s46_s18, %s46_s18 }
  0x2c   :  { %p640_p5 = scmp.ne.s32.totalorder %s46_s18, %s639_s14  ;;  %p645_p7 = scmp.lt.s32.totalorder %s639_s14, %s639_s14 }
  0x2e   :  { %p646_p8 = por %p645_p7, %p644_p6 }
  0x30   :  { %p647_p9 = pnand %p646_p8, %p640_p5 }
  0x32   :  { %650 = shalt.err (!%p647_p9)
}
  0x33   :  { %51 = dma.hbm_to_vmem [thread:$0]  %s863_s3, 1024, %s46_s18, [#allocation6], %s704_s11, %s704_s11, %s705_s12  }
  0x34   :  { %s708_s16 = smov [#allocation8]   ;;  %s651_s21 = scalar_lea.hbm %s865_s5, 1024 }
  0x35   :  { %s59_s17 = sshll.u32 %s708_s16, 4  ;;  %p652_p10 = scmp.ne.s32.totalorder %s865_s5, %s651_s21  ;;  %s60_s17 = int_to_ptr.vmem [resolvable:$true] %s59_s17 }
  0x36   :  { %p655_p11 = scmp.lt.u32.totalorder %s651_s21, %s865_s5 }
  0x38   :  { %p657_p12 = pnand %p655_p11, %p652_p10 }
  0x3a   :  { %660 = shalt.err (!%p657_p12)
}
  0x3b   :  { %s661_s1 = scalar_lea.vmem %s60_s17, 1024  ;;  %p666_p0 = scmp.lt.s32.totalorder %s60_s17, %s60_s17 }
  0x3c   :  { %p662_p13 = scmp.ne.s32.totalorder %s60_s17, %s661_s1  ;;  %p667_p1 = scmp.lt.s32.totalorder %s661_s1, %s661_s1 }
  0x3e   :  { %p668_p2 = por %p667_p1, %p666_p0 }
  0x40   :  { %p669_p3 = pnand %p668_p2, %p662_p13 }
  0x42   :  { %672 = shalt.err (!%p669_p3)
}
  0x43   :  { %65 = dma.hbm_to_vmem [thread:$0]  %s865_s5, 1024, %s60_s17, [#allocation9], %s704_s11, %s704_s11, %s705_s12  }
  0x44   :  { %695 = dma.done.wait [#allocation3], 128  }
  0x45   :  { %696 = vsyncadd [#allocation3], 4294967168 }
  0x46   :  { %697 = dma.done.wait [#allocation6], 2048  }
  0x47   :  { %698 = vsyncadd [#allocation6], 4294965248 }
  0x48   :  { %699 = dma.done.wait [#allocation9], 1024  }
  0x49   :  { %700 = vsyncadd [#allocation9], 4294966272  ;;  %v709_v0 = vmov 0.0   ;;  %vm710_vm0 = vmmov 0   ;;  %v561_v1 = vld [vmem:[#allocation5] sm:$0xff]   ;;  %v562_v2 = vld [vmem:[#allocation5 + $0x8] sm:$0xff]  }
  0x4a   :  { %492 = vmatprep.subr.bf16.mxu0 %v709_v0  ;;  %508 = vmatprep.mubr.msk.bf16.mxu0 %vm710_vm0, %v709_v0  ;;  %v563_v3 = vld [vmem:[#allocation5 + $0x10] sm:$0xff]   ;;  %v569_v4 = vld [vmem:[#allocation7] sm:$0xff]   ;;  %v564_v5 = vld [vmem:[#allocation5 + $0x18] sm:$0xff]   ;;  %s711_s28 = smov [#allocation10]  }
  0x4b   :  { %512 = vmatprep.subr.bf16.mxu1 %v709_v0  ;;  %528 = vmatprep.mubr.msk.bf16.mxu1 %vm710_vm0, %v709_v0  ;;  %v570_v6 = vld [vmem:[#allocation7 + $0x8] sm:$0xff]   ;;  %v565_v7 = vld [vmem:[#allocation5 + $0x20] sm:$0xff]   ;;  %v571_v8 = vld [vmem:[#allocation7 + $0x10] sm:$0xff]   ;;  %s427_s29 = sshll.u32 %s711_s28, 4  ;;  %s428_s29 = int_to_ptr.vmem [resolvable:$true] %s427_s29 }
  0x4c   :  { %493 = vmatpush3.bf16.msra.mxu0 %v561_v1  ;;  %513 = vmatpush3.bf16.msra.mxu1 %v569_v4  ;;  %v566_v9 = vld [vmem:[#allocation5 + $0x28] sm:$0xff]   ;;  %v572_v10 = vld [vmem:[#allocation7 + $0x18] sm:$0xff]   ;;  %v567_v11 = vld [vmem:[#allocation5 + $0x30] sm:$0xff]   ;;  %p678_p5 = scmp.lt.s32.totalorder %s428_s29, %s428_s29 }
  0x4d   :  { %494 = vmatprep.subr.bf16.mxu0 %v709_v0  ;;  %514 = vmatprep.subr.bf16.mxu1 %v709_v0  ;;  %v573_v12 = vld [vmem:[#allocation7 + $0x20] sm:$0xff]   ;;  %v568_v13 = vld [vmem:[#allocation5 + $0x38] sm:$0xff]   ;;  %v574_v15 = vld [vmem:[#allocation7 + $0x28] sm:$0xff]  }
  0x4e   :  { %v81_v14 = vld [vmem:[#allocation2] sm:$0xff]  ;;  %v575_v17 = vld [vmem:[#allocation7 + $0x30] sm:$0xff]   ;;  %v577_v19 = vld [vmem:[#allocation8] sm:$0xff]  }
  0x4f   :  { %v99_v16 = vpack.c.bf16 %v81_v14, %v81_v14  ;;  %v576_v18 = vld [vmem:[#allocation7 + $0x38] sm:$0xff]   ;;  %v578_v20 = vld [vmem:[#allocation8 + $0x8] sm:$0xff]   ;;  %v579_v21 = vld [vmem:[#allocation8 + $0x10] sm:$0xff]  }
  0x50   :  { %495 = vmatpush3.bf16.msra.mxu0 %v562_v2  ;;  %515 = vmatpush3.bf16.msra.mxu1 %v570_v6  ;;  %v580_v22 = vld [vmem:[#allocation8 + $0x18] sm:$0xff]   ;;  %v581_v23 = vld [vmem:[#allocation8 + $0x20] sm:$0xff]   ;;  %v582_v24 = vld [vmem:[#allocation8 + $0x28] sm:$0xff]  }
  0x51   :  { %496 = vmatprep.subr.bf16.mxu0 %v709_v0  ;;  %516 = vmatprep.subr.bf16.mxu1 %v709_v0  ;;  %v438_v25 = vld [vmem:[%s862_s2] ss:$0 sm:$0xff]  ;;  %v583_v33 = vld [vmem:[#allocation8 + $0x30] sm:$0xff]  }
  0x52   :  { %v584_v34 = vld [vmem:[#allocation8 + $0x38] sm:$0xff]  }
  0x53   :  { %v447_v35 = vld [vmem:[%s864_s4] ss:$0 sm:$0xff]  ;;  %s673_s4 = scalar_lea.vmem %s428_s29, 128 }
  0x54   :  { %497 = vmatpush3.bf16.msra.mxu0 %v563_v3  ;;  %517 = vmatpush3.bf16.msra.mxu1 %v571_v8  ;;  %v456_v43 = vld [vmem:[%s866_s6] ss:$0 sm:$0xff]  ;;  %p674_p4 = scmp.ne.s32.totalorder %s428_s29, %s673_s4  ;;  %p679_p6 = scmp.lt.s32.totalorder %s673_s4, %s673_s4 }
  0x55   :  { %498 = vmatprep.subr.bf16.mxu0 %v709_v0  ;;  %518 = vmatprep.subr.bf16.mxu1 %v709_v0 }
  0x56   :  { %p680_p7 = por %p679_p6, %p678_p5 }
  0x58   :  { %499 = vmatpush3.bf16.msra.mxu0 %v564_v5  ;;  %519 = vmatpush3.bf16.msra.mxu1 %v572_v10  ;;  %p681_p8 = pnand %p680_p7, %p674_p4 }
  0x59   :  { %500 = vmatprep.subr.bf16.mxu0 %v709_v0  ;;  %520 = vmatprep.subr.bf16.mxu1 %v709_v0 }
  0x5c   :  { %501 = vmatpush3.bf16.msra.mxu0 %v565_v7  ;;  %521 = vmatpush3.bf16.msra.mxu1 %v573_v12 }
  0x5d   :  { %502 = vmatprep.subr.bf16.mxu0 %v709_v0  ;;  %522 = vmatprep.subr.bf16.mxu1 %v709_v0 }
  0x60   :  { %503 = vmatpush3.bf16.msra.mxu0 %v566_v9  ;;  %523 = vmatpush3.bf16.msra.mxu1 %v574_v15 }
  0x61   :  { %504 = vmatprep.subr.bf16.mxu0 %v709_v0  ;;  %524 = vmatprep.subr.bf16.mxu1 %v709_v0 }
  0x64   :  { %505 = vmatpush3.bf16.msra.mxu0 %v567_v11  ;;  %525 = vmatpush3.bf16.msra.mxu1 %v575_v17 }
  0x65   :  { %506 = vmatprep.subr.bf16.mxu0 %v709_v0  ;;  %526 = vmatprep.subr.bf16.mxu1 %v709_v0 }
  0x68   :  { %507 = vmatpush3.bf16.msra.mxu0 %v568_v13  ;;  %527 = vmatpush3.bf16.msra.mxu1 %v576_v18 }
  0x69   :  { %532 = vmatprep.subr.bf16.mxu0 %v709_v0 }
  0x6b   :  { %509 = vmatmul.mubr.bf16.vlgmr.msra.gmra.mrb[0].mxu0 %v99_v16 }
  0x6c   :  { %548 = vmatprep.mubr.msk.bf16.mxu0 %vm710_vm0, %v709_v0  ;;  %533 = vmatpush3.bf16.msra.mxu0 %v577_v19 }
  0x6d   :  { %534 = vmatprep.subr.bf16.mxu0 %v709_v0 }
  0x70   :  { %535 = vmatpush3.bf16.msra.mxu0 %v578_v20 }
  0x71   :  { %536 = vmatprep.subr.bf16.mxu0 %v709_v0 }
  0x74   :  { %537 = vmatpush3.bf16.msra.mxu0 %v579_v21 }
  0x75   :  { %538 = vmatprep.subr.bf16.mxu0 %v709_v0 }
  0x78   :  { %539 = vmatpush3.bf16.msra.mxu0 %v580_v22 }
  0x79   :  { %540 = vmatprep.subr.bf16.mxu0 %v709_v0 }
  0x7c   :  { %541 = vmatpush3.bf16.msra.mxu0 %v581_v23 }
  0x7d   :  { %542 = vmatprep.subr.bf16.mxu0 %v709_v0 }
  0x80   :  { %543 = vmatpush3.bf16.msra.mxu0 %v582_v24 }
  0x81   :  { %544 = vmatprep.subr.bf16.mxu0 %v709_v0 }
  0x84   :  { %545 = vmatpush3.bf16.msra.mxu0 %v583_v33 }
  0x85   :  { %546 = vmatprep.subr.bf16.mxu0 %v709_v0 }
  0x88   :  { %547 = vmatpush3.bf16.msra.mxu0 %v584_v34 }
 0x13e   :  { %v188_v26 = vpop.f32.mrb[0].mxu0 }
 0x13f   :  { %v189_v27 = vadd.f32 %v438_v25, %v188_v26  ;;  %v510_v28 = vpop.f32.mrb[1].mxu0 }
 0x140   :  { %v191_v29 = vpop.f32.mrb[2].mxu0 }
 0x141   :  { %v194_v30 = vmax.f32 %v189_v27, 0.0  ;;  %v511_v31 = vpop.f32.mrb[3].mxu0 }
 0x143   :  { %v212_v32 = vpack.c.bf16 %v194_v30, %v194_v30 }
 0x145   :  { %529 = vmatmul.mubr.bf16.vlgmr.msra.gmra.mrb[0].mxu1 %v212_v32 }
 0x218   :  { %v301_v36 = vpop.f32.mrb[0].mxu1 }
 0x219   :  { %v302_v37 = vadd.f32 %v447_v35, %v301_v36  ;;  %v530_v38 = vpop.f32.mrb[1].mxu1 }
 0x21a   :  { %v304_v39 = vpop.f32.mrb[2].mxu1 }
 0x21b   :  { %v307_v40 = vmax.f32 %v302_v37, 0.0  ;;  %v531_v41 = vpop.f32.mrb[3].mxu1 }
 0x21d   :  { %v325_v42 = vpack.c.bf16 %v307_v40, %v307_v40 }
 0x21f   :  { %549 = vmatmul.mubr.bf16.vlgmr.msra.gmra.mrb[4].mxu0 %v325_v42 }
 0x2f2   :  { %v414_v44 = vpop.f32.mrb[4].mxu0 }
 0x2f3   :  { %v415_v45 = vadd.f32 %v456_v43, %v414_v44  ;;  %v550_v46 = vpop.f32.mrb[5].mxu0 }
 0x2f4   :  { %v417_v47 = vpop.f32.mrb[6].mxu0 }
 0x2f5   :  { %420 = vst [vmem:[#allocation10] sm:$0xff] %v415_v45  ;;  %v551_v48 = vpop.f32.mrb[7].mxu0 }
 0x2f6   :  { %684 = shalt.err (!%p681_p8)
}
 0x2f7   :  { %s685_s6 = scalar_lea.hbm %s867_s7, 128 }
 0x2f8   :  { %p686_p9 = scmp.ne.s32.totalorder %s867_s7, %s685_s6  ;;  %p689_p10 = scmp.lt.u32.totalorder %s685_s6, %s867_s7 }
 0x2fa   :  { %p691_p11 = pnand %p689_p10, %p686_p9 }
 0x2fc   :  { %694 = shalt.err (!%p691_p11)
}
 0x2fd   :  { %430 = dma.vmem_to_hbm [thread:$0]  %s428_s29, 128, %s867_s7, [#allocation4]  }
 0x2fe   :  { %701 = dma.done.wait [#allocation4], 128  }
 0x2ff   :  { %702 = vsyncadd [#allocation4], 4294967168 }
 0x300   :  { %434 = vsyncpa [#allocation3], 1 }
 0x301   :  { %435 = vsyncpa [#allocation6], 1 }
 0x302   :  { %436 = vsyncpa [#allocation9], 1 }
 0x303   :  { %437 = vsyncpa [#allocation4], 1 }

</bundles_post_ra>
